<compile_context>
chip_gen: v7x
topology: tpu7x:2x2x1
jax: 0.10.0
libtpu: 0.0.40
codegen_flags: <defaults>
</compile_context>

<pallas_src>
import jax
import jax.numpy as jnp
from jax.experimental import pallas as pl
from jax.experimental.pallas import tpu as pltpu


# ----------------------------------------------------------------------------
# Pallas kernel
# ----------------------------------------------------------------------------
def _make_cagke_kernel(E, B, ts, tl, seq_len_true, norm_flag, exp_dtype, op_dtype):
    """Kernel for one (discrete var d, time strip j, source block s) grid step."""

    def kernel(a_ref, w_ref, x_ref, o_ref, yacc_ref, dacc_ref):
        # a_ref, w_ref : SMEM (num_dis*E,) : a_e = 0.5/sigma_e^2, mixing weights
        # x_ref        : VMEM (B, ts)      : source block of this discrete column
        # o_ref        : VMEM (B, tl)      : output time strip (resident over s)
        # yacc_ref     : VMEM (E, B, tl) f32 : per-bandwidth numerators
        # dacc_ref     : VMEM (E, 1, tl) f32 : per-bandwidth normalizers
        d = pl.program_id(0)
        t0 = pl.program_id(1) * tl
        sblk = pl.program_id(2)
        s0 = sblk * ts

        @pl.when(sblk == 0)
        def _init():
            yacc_ref[...] = jnp.zeros_like(yacc_ref)
            if norm_flag:
                dacc_ref[...] = jnp.zeros_like(dacc_ref)

        # Squared time distance (s - t)^2 for this (ts, tl) tile.  Built in f32
        # (avoids int32 overflow for very long sequences), then cast to the exp
        # compute dtype (bf16 on v6e/v7x, f32 on v5e/older).
        s_idx = jax.lax.broadcasted_iota(jnp.int32, (ts, tl), 0) + s0
        t_idx = jax.lax.broadcasted_iota(jnp.int32, (ts, tl), 1) + t0
        diff = (s_idx - t_idx).astype(jnp.float32)
        d2 = (diff * diff).astype(exp_dtype)                        # (ts, tl)

        # Valid-source mask: padded rows (s >= true length) must not count in
        # the normalizer (their x is zero-padded, so the numerator is fine).
        s_row = jax.lax.broadcasted_iota(jnp.int32, (1, ts), 1) + s0
        valid = (s_row < seq_len_true).astype(op_dtype)             # (1, ts)

        x = x_ref[...].astype(op_dtype)                             # (B, ts)

        def body(e, carry):
            a_e = a_ref[d * E + e]
            k = jnp.exp(d2 * (-a_e).astype(exp_dtype)).astype(op_dtype)  # (ts, tl)
            # Numerator: x @ K  (MXU, f32 accumulation).
            y = jax.lax.dot_general(x, k, (((1,), (0,)), ((), ())),
                                    preferred_element_type=jnp.float32)
            yacc_ref[e] = yacc_ref[e] + y
            if norm_flag:
                # Normalizer via masked-ones row matmul (MXU, not an XLU reduce).
                den = jax.lax.dot_general(valid, k, (((1,), (0,)), ((), ())),
                                          preferred_element_type=jnp.float32)
                dacc_ref[e] = dacc_ref[e] + den
            return carry

        jax.lax.fori_loop(0, E, body, 0, unroll=True)

        @pl.when(sblk == pl.num_programs(2) - 1)
        def _finalize():
            acc = jnp.zeros((B, tl), jnp.float32)
            for e in range(E):                                      # tiny static combine
                w_e = w_ref[d * E + e]
                y_e = yacc_ref[e]
                if norm_flag:
                    y_e = y_e / jnp.maximum(dacc_ref[e], 1e-30)     # guard padded cols
                acc = acc + w_e * y_e
            o_ref[...] = acc.astype(o_ref.dtype)

    return kernel


def _choose_tile(L, num_dis, max_tile=512):
    """Tile for both the output-time and source-time axes (always == full L or
    a multiple of 128).  Ensures >= 2 parallel grid steps when num_dis == 1 so
    the v7x megacore is not left half idle."""
    if num_dis >= 2 or L <= 128:
        return L if L <= max_tile else max_tile
    half = -(-L // 2)
    half = -(-half // 128) * 128
    return min(half, max_tile)


def cagke_pallas(a_flat, w_flat, x_dis, *, norm_flag=True, tile=None):
    """a_flat, w_flat: (num_dis*E,) f32; x_dis: (num_dis, B, L) f32 -> same shape."""
    num_dis, B, L = x_dis.shape
    E = a_flat.shape[0] // num_dis

    try:
        kind = jax.devices()[0].device_kind.lower()
    except Exception:
        kind = ""
    # bf16 exp only where the EUP has a bf16 path (v6e / v7x).
    use_bf16_exp = ("v6" in kind) or ("v7" in kind) or ("7x" in kind)
    exp_dtype = jnp.bfloat16 if use_bf16_exp else jnp.float32
    op_dtype = jnp.bfloat16                       # MXU operands; f32 accumulation
    # v2-v6 have 128 MiB VMEM per core; v7x only 64 MiB.
    big_vmem = any(v in kind for v in ("v2", "v3", "v4", "v5", "v6"))
    vmem_limit = (96 if big_vmem else 32) * 1024 * 1024

    if tile is None:
        tile = _choose_tile(L, num_dis)
    L_pad = -(-L // tile) * tile
    if L_pad != L:
        x_dis = jnp.pad(x_dis, ((0, 0), (0, 0), (0, L_pad - L)))
    n_strips = L_pad // tile                      # output-time strips
    n_sblocks = L_pad // tile                     # source-time blocks (reduction)

    kernel = _make_cagke_kernel(E, B, tile, tile, L, norm_flag, exp_dtype, op_dtype)
    out = pl.pallas_call(
        kernel,
        out_shape=jax.ShapeDtypeStruct((num_dis, B, L_pad), jnp.float32),
        grid=(num_dis, n_strips, n_sblocks),
        in_specs=[
            pl.BlockSpec(memory_space=pltpu.MemorySpace.SMEM),      # a = 0.5/sigma^2
            pl.BlockSpec(memory_space=pltpu.MemorySpace.SMEM),      # mixing weights
            pl.BlockSpec((None, B, tile), lambda d, j, s: (d, 0, s)),
        ],
        out_specs=pl.BlockSpec((None, B, tile), lambda d, j, s: (d, 0, j)),
        scratch_shapes=[
            pltpu.VMEM((E, B, tile), jnp.float32),                  # per-e numerators
            pltpu.VMEM((E, 1, tile), jnp.float32),                  # per-e normalizers
        ],
        compiler_params=pltpu.CompilerParams(
            dimension_semantics=("parallel", "parallel", "arbitrary"),
            vmem_limit_bytes=vmem_limit),
    )(a_flat, w_flat, x_dis)
    return out[:, :, :L]


# ----------------------------------------------------------------------------
# Wrapper reproducing CAGKE_Multi.forward semantics.
# ----------------------------------------------------------------------------
def init_cagke_multi_params(length, num_dis, embed_dim, sigma_min=0.4, sigma_max=4.0):
    """Deterministic parameter init: one learnable sigma set + mixing weights
    per discrete variable (i.e. per CAGKE unit)."""
    theta = jnp.linspace(-1.0, 1.0, num_dis * embed_dim,
                         dtype=jnp.float32).reshape(num_dis, embed_dim)
    sigma = sigma_min + (sigma_max - sigma_min) * jax.nn.sigmoid(theta)
    w = jnp.full((num_dis, embed_dim), 1.0 / embed_dim, jnp.float32) \
        + 0.01 * jnp.arange(num_dis * embed_dim,
                            dtype=jnp.float32).reshape(num_dis, embed_dim)
    return sigma, w


def cagke_multi_forward(X, sigma, w, *, type_flag, norm_flag=True):
    """X: (B, L, p) f32.  type_flag: static tuple of bools (len p).  Continuous
    columns (True) pass through; each discrete column is replaced by its CAGKE
    embedding (one CAGKE unit per discrete column)."""
    dis_idx = [i for i, f in enumerate(type_flag) if not f]
    if not dis_idx:
        return X
    a_flat = (0.5 / (sigma * sigma)).reshape(-1)                    # (num_dis*E,)
    w_flat = w.reshape(-1)
    idx = jnp.asarray(dis_idx, jnp.int32)
    x_dis = jnp.transpose(X[:, :, idx], (2, 0, 1))                  # (num_dis, B, L)
    y = cagke_pallas(a_flat, w_flat, x_dis, norm_flag=norm_flag)    # (num_dis, B, L)
    # TODO(synk): gather/transpose/scatter here are extra HBM passes; donate X
    #             at the jit boundary if this ever becomes measurable.
    return X.at[:, :, idx].set(jnp.transpose(y, (1, 2, 0)))


# ----------------------------------------------------------------------------
# Pure-JAX reference (same math, no Pallas).
# ----------------------------------------------------------------------------
def cagke_multi_reference(X, sigma, w, *, type_flag, norm_flag=True):
    B, L, p = X.shape
    t = jnp.arange(L, dtype=jnp.float32)
    d2 = (t[:, None] - t[None, :]) ** 2
    X_con = X
    d = 0
    for i in range(p):
        if type_flag[i]:
            continue
        col = X[:, :, i]                                            # (B, L)
        acc = jnp.zeros_like(col)
        for e in range(sigma.shape[1]):
            k = jnp.exp(-d2 / (2.0 * sigma[d, e] ** 2))
            if norm_flag:
                k = k / jnp.sum(k, axis=1, keepdims=True)
            acc = acc + w[d, e] * (col @ k.T)
        X_con = X_con.at[:, :, i].set(acc)
        d += 1
    return X_con


if __name__ == "__main__":
    try:
        _kind = jax.devices()[0].device_kind.lower()
    except Exception:
        _kind = ""
    _bf16_exp = ("v6" in _kind) or ("v7" in _kind) or ("7x" in _kind)
    # bf16 exp / bf16 MXU operands trade accuracy for EUP throughput; relax the
    # reference tolerance accordingly (review: expect ~1e-2 relative).
    TOL = 1e-1 if _bf16_exp else 3e-2

    def run_case(B, L, type_flag, embed_dim, key):
        p = len(type_flag)
        num_dis = sum(1 for f in type_flag if not f)
        kx, kd = jax.random.split(key)
        X = jax.random.normal(kx, (B, L, p), dtype=jnp.float32)
        dis_idx = jnp.asarray([i for i, f in enumerate(type_flag) if not f], jnp.int32)
        con_idx = jnp.asarray([i for i, f in enumerate(type_flag) if f], jnp.int32)
        # Make discrete columns actually discrete-valued (categories 0..2).
        disc = jax.random.randint(kd, (B, L, num_dis), 0, 3).astype(jnp.float32)
        X = X.at[:, :, dis_idx].set(disc)

        sigma, w = init_cagke_multi_params(L, num_dis, embed_dim)
        fwd = jax.jit(cagke_multi_forward, static_argnames=("type_flag", "norm_flag"))
        out = jax.block_until_ready(fwd(X, sigma, w, type_flag=type_flag))
        ref = cagke_multi_reference(X, sigma, w, type_flag=type_flag)

        assert out.shape == X.shape
        if con_idx.size:  # continuous columns pass through exactly
            assert bool(jnp.array_equal(out[:, :, con_idx], X[:, :, con_idx]))
        err = float(jnp.max(jnp.abs(out[:, :, dis_idx] - ref[:, :, dis_idx])))
        assert err <= TOL, f"mismatch vs reference: max abs err {err}"

    key = jax.random.PRNGKey(0)
    k1, k2 = jax.random.split(key)
    # Small shapes consistent with the module: X of shape (batch, length, p).
    run_case(B=2, L=16, type_flag=(True, False, True, False), embed_dim=4, key=k1)
    # Longer, non-tile-multiple length: exercises zero padding, the s-axis
    # reduction across grid steps and multiple output-time strips.
    run_case(B=2, L=600, type_flag=(False, True, False), embed_dim=4, key=k2)

    print("KERNEL_OK")
</pallas_src>

<mosaic_0001>
module attributes {stable_mosaic.version = 11 : i64} {
  func.func @kernel(%arg0: i32, %arg1: i32, %arg2: i32, %arg3: memref<8xf32, #tpu.memory_space<smem>>, %arg4: memref<8xf32, #tpu.memory_space<smem>>, %arg5: memref<1x2x16xf32, #tpu.memory_space<vmem>>, %arg6: memref<1x2x16xf32, #tpu.memory_space<vmem>>, %arg7: memref<4x2x16xf32, #tpu.memory_space<vmem>>, %arg8: memref<4x1x16xf32, #tpu.memory_space<vmem>>) attributes {dimension_semantics = [#tpu.dimension_semantics<parallel>, #tpu.dimension_semantics<parallel>, #tpu.dimension_semantics<arbitrary>], iteration_bounds = array<i64: 2, 1, 1>, scalar_prefetch = 0 : i64, scratch_operands = 2 : i64, tpu.core_type = #tpu.core_type<tc>, window_params = [{transform_indices = @transform_0, window_bounds = array<i64: 8>}, {transform_indices = @transform_1, window_bounds = array<i64: 8>}, {transform_indices = @transform_2, window_bounds = array<i64: 1, 2, 16>}, {transform_indices = @transform_3, window_bounds = array<i64: 1, 2, 16>}]} {
    %c16_i32 = arith.constant 16 : i32
    %0 = arith.muli %arg1, %c16_i32 : i32
    %c16_i32_0 = arith.constant 16 : i32
    %1 = arith.muli %arg2, %c16_i32_0 : i32
    %c0_i32 = arith.constant 0 : i32
    %2 = arith.cmpi eq, %arg2, %c0_i32 : i32
    %3 = arith.extui %2 : i1 to i32
    %c0_i32_1 = arith.constant 0 : i32
    %4 = arith.cmpi ne, %3, %c0_i32_1 : i32
    scf.if %4 {
      %cst_55 = arith.constant 0.000000e+00 : f32
      %136 = vector.broadcast %cst_55 : f32 to vector<4x2x16xf32>
      %c0_56 = arith.constant 0 : index
      %c0_57 = arith.constant 0 : index
      %c0_58 = arith.constant 0 : index
      %137 = vector.load %arg7[%c0_56, %c0_57, %c0_58] : memref<4x2x16xf32, #tpu.memory_space<vmem>>, vector<4x2x16xf32>
      tpu.vector_store %arg7[%c0_56, %c0_57, %c0_58], %136 {strides = array<i32>} : memref<4x2x16xf32, #tpu.memory_space<vmem>>, vector<4x2x16xf32>,
      %cst_59 = arith.constant 0.000000e+00 : f32
      %138 = vector.broadcast %cst_59 : f32 to vector<4x1x16xf32>
      %c0_60 = arith.constant 0 : index
      %c0_61 = arith.constant 0 : index
      %c0_62 = arith.constant 0 : index
      %139 = vector.load %arg8[%c0_60, %c0_61, %c0_62] : memref<4x1x16xf32, #tpu.memory_space<vmem>>, vector<4x1x16xf32>
      tpu.vector_store %arg8[%c0_60, %c0_61, %c0_62], %138 {strides = array<i32>} : memref<4x1x16xf32, #tpu.memory_space<vmem>>, vector<4x1x16xf32>,
    } else {
    }
    %5 = tpu.iota {dimensions = array<i32: 0>} : vector<16x16xi32>
    %6 = vector.broadcast %1 : i32 to vector<16x16xi32>
    %7 = arith.addi %5, %6 : vector<16x16xi32>
    %8 = tpu.iota {dimensions = array<i32: 1>} : vector<16x16xi32>
    %9 = vector.broadcast %0 : i32 to vector<16x16xi32>
    %10 = arith.addi %8, %9 : vector<16x16xi32>
    %11 = arith.subi %7, %10 : vector<16x16xi32>
    %12 = arith.sitofp %11 : vector<16x16xi32> to vector<16x16xf32>
    %13 = arith.mulf %12, %12 : vector<16x16xf32>
    %14 = tpu.iota {dimensions = array<i32: 1>} : vector<1x16xi32>
    %15 = vector.broadcast %1 : i32 to vector<1x16xi32>
    %16 = arith.addi %14, %15 : vector<1x16xi32>
    %c16_i32_2 = arith.constant 16 : i32
    %17 = vector.broadcast %c16_i32_2 : i32 to vector<1x16xi32>
    %18 = arith.cmpi slt, %16, %17 : vector<1x16xi32>
    %19 = arith.extui %18 : vector<1x16xi1> to vector<1x16xi32>
    %20 = arith.sitofp %19 : vector<1x16xi32> to vector<1x16xf32>
    %21 = arith.truncf %20 : vector<1x16xf32> to vector<1x16xbf16>
    %c0 = arith.constant 0 : index
    %c0_3 = arith.constant 0 : index
    %c0_4 = arith.constant 0 : index
    %22 = vector.load %arg5[%c0, %c0_3, %c0_4] : memref<1x2x16xf32, #tpu.memory_space<vmem>>, vector<1x2x16xf32>
    %23 = vector.shape_cast %22 : vector<1x2x16xf32> to vector<2x16xf32>
    %24 = arith.truncf %23 : vector<2x16xf32> to vector<2x16xbf16>
    %c0_i32_5 = arith.constant 0 : i32
    %c4_i32 = arith.constant 4 : i32
    %25 = arith.muli %arg0, %c4_i32 : i32
    %26 = arith.addi %25, %c0_i32_5 : i32
    %27 = arith.index_cast %26 : i32 to index
    %28 = memref.load %arg3[%27] : memref<8xf32, #tpu.memory_space<smem>>
    %cst = arith.constant 0.000000e+00 : f32
    %29 = arith.subf %cst, %28 : f32
    %30 = vector.broadcast %29 : f32 to vector<16x16xf32>
    %31 = arith.mulf %13, %30 : vector<16x16xf32>
    %32 = math.exp %31 : vector<16x16xf32>
    %33 = arith.truncf %32 : vector<16x16xf32> to vector<16x16xbf16>
    %cst_6 = arith.constant dense<0.000000e+00> : vector<2x16xf32>
    %34 = tpu.matmul %24, %33, %cst_6 {dimension_numbers = #tpu.dot_dimension_numbers<[1], [0], [0], [1], [0, 0, 1, 1], [], []>} : vector<2x16xbf16>, vector<16x16xbf16>, vector<2x16xf32> -> vector<2x16xf32>
    %35 = arith.index_cast %c0_i32_5 : i32 to index
    %c0_7 = arith.constant 0 : index
    %c0_8 = arith.constant 0 : index
    %36 = vector.load %arg7[%35, %c0_7, %c0_8] : memref<4x2x16xf32, #tpu.memory_space<vmem>>, vector<1x2x16xf32>
    %37 = vector.shape_cast %36 : vector<1x2x16xf32> to vector<2x16xf32>
    %38 = arith.addf %37, %34 : vector<2x16xf32>
    %39 = arith.index_cast %c0_i32_5 : i32 to index
    %c0_9 = arith.constant 0 : index
    %c0_10 = arith.constant 0 : index
    %40 = vector.load %arg7[%39, %c0_9, %c0_10] : memref<4x2x16xf32, #tpu.memory_space<vmem>>, vector<1x2x16xf32>
    %41 = vector.shape_cast %40 : vector<1x2x16xf32> to vector<2x16xf32>
    %42 = vector.shape_cast %38 : vector<2x16xf32> to vector<1x2x16xf32>
    tpu.vector_store %arg7[%39, %c0_9, %c0_10], %42 {strides = array<i32>} : memref<4x2x16xf32, #tpu.memory_space<vmem>>, vector<1x2x16xf32>,
    %cst_11 = arith.constant dense<0.000000e+00> : vector<1x16xf32>
    %43 = tpu.matmul %21, %33, %cst_11 {dimension_numbers = #tpu.dot_dimension_numbers<[1], [0], [0], [1], [0, 0, 1, 1], [], []>} : vector<1x16xbf16>, vector<16x16xbf16>, vector<1x16xf32> -> vector<1x16xf32>
    %44 = arith.index_cast %c0_i32_5 : i32 to index
    %c0_12 = arith.constant 0 : index
    %c0_13 = arith.constant 0 : index
    %45 = vector.load %arg8[%44, %c0_12, %c0_13] : memref<4x1x16xf32, #tpu.memory_space<vmem>>, vector<1x1x16xf32>
    %46 = vector.shape_cast %45 : vector<1x1x16xf32> to vector<1x16xf32>
    %47 = arith.addf %46, %43 : vector<1x16xf32>
    %48 = arith.index_cast %c0_i32_5 : i32 to index
    %c0_14 = arith.constant 0 : index
    %c0_15 = arith.constant 0 : index
    %49 = vector.load %arg8[%48, %c0_14, %c0_15] : memref<4x1x16xf32, #tpu.memory_space<vmem>>, vector<1x1x16xf32>
    %50 = vector.shape_cast %49 : vector<1x1x16xf32> to vector<1x16xf32>
    %51 = vector.shape_cast %47 : vector<1x16xf32> to vector<1x1x16xf32>
    tpu.vector_store %arg8[%48, %c0_14, %c0_15], %51 {strides = array<i32>} : memref<4x1x16xf32, #tpu.memory_space<vmem>>, vector<1x1x16xf32>,
    %c1_i32 = arith.constant 1 : i32
    %c4_i32_16 = arith.constant 4 : i32
    %52 = arith.muli %arg0, %c4_i32_16 : i32
    %53 = arith.addi %52, %c1_i32 : i32
    %54 = arith.index_cast %53 : i32 to index
    %55 = memref.load %arg3[%54] : memref<8xf32, #tpu.memory_space<smem>>
    %cst_17 = arith.constant 0.000000e+00 : f32
    %56 = arith.subf %cst_17, %55 : f32
    %57 = vector.broadcast %56 : f32 to vector<16x16xf32>
    %58 = arith.mulf %13, %57 : vector<16x16xf32>
    %59 = math.exp %58 : vector<16x16xf32>
    %60 = arith.truncf %59 : vector<16x16xf32> to vector<16x16xbf16>
    %cst_18 = arith.constant dense<0.000000e+00> : vector<2x16xf32>
    %61 = tpu.matmul %24, %60, %cst_18 {dimension_numbers = #tpu.dot_dimension_numbers<[1], [0], [0], [1], [0, 0, 1, 1], [], []>} : vector<2x16xbf16>, vector<16x16xbf16>, vector<2x16xf32> -> vector<2x16xf32>
    %62 = arith.index_cast %c1_i32 : i32 to index
    %c0_19 = arith.constant 0 : index
    %c0_20 = arith.constant 0 : index
    %63 = vector.load %arg7[%62, %c0_19, %c0_20] : memref<4x2x16xf32, #tpu.memory_space<vmem>>, vector<1x2x16xf32>
    %64 = vector.shape_cast %63 : vector<1x2x16xf32> to vector<2x16xf32>
    %65 = arith.addf %64, %61 : vector<2x16xf32>
    %66 = arith.index_cast %c1_i32 : i32 to index
    %c0_21 = arith.constant 0 : index
    %c0_22 = arith.constant 0 : index
    %67 = vector.load %arg7[%66, %c0_21, %c0_22] : memref<4x2x16xf32, #tpu.memory_space<vmem>>, vector<1x2x16xf32>
    %68 = vector.shape_cast %67 : vector<1x2x16xf32> to vector<2x16xf32>
    %69 = vector.shape_cast %65 : vector<2x16xf32> to vector<1x2x16xf32>
    tpu.vector_store %arg7[%66, %c0_21, %c0_22], %69 {strides = array<i32>} : memref<4x2x16xf32, #tpu.memory_space<vmem>>, vector<1x2x16xf32>,
    %cst_23 = arith.constant dense<0.000000e+00> : vector<1x16xf32>
    %70 = tpu.matmul %21, %60, %cst_23 {dimension_numbers = #tpu.dot_dimension_numbers<[1], [0], [0], [1], [0, 0, 1, 1], [], []>} : vector<1x16xbf16>, vector<16x16xbf16>, vector<1x16xf32> -> vector<1x16xf32>
    %71 = arith.index_cast %c1_i32 : i32 to index
    %c0_24 = arith.constant 0 : index
    %c0_25 = arith.constant 0 : index
    %72 = vector.load %arg8[%71, %c0_24, %c0_25] : memref<4x1x16xf32, #tpu.memory_space<vmem>>, vector<1x1x16xf32>
    %73 = vector.shape_cast %72 : vector<1x1x16xf32> to vector<1x16xf32>
    %74 = arith.addf %73, %70 : vector<1x16xf32>
    %75 = arith.index_cast %c1_i32 : i32 to index
    %c0_26 = arith.constant 0 : index
    %c0_27 = arith.constant 0 : index
    %76 = vector.load %arg8[%75, %c0_26, %c0_27] : memref<4x1x16xf32, #tpu.memory_space<vmem>>, vector<1x1x16xf32>
    %77 = vector.shape_cast %76 : vector<1x1x16xf32> to vector<1x16xf32>
    %78 = vector.shape_cast %74 : vector<1x16xf32> to vector<1x1x16xf32>
    tpu.vector_store %arg8[%75, %c0_26, %c0_27], %78 {strides = array<i32>} : memref<4x1x16xf32, #tpu.memory_space<vmem>>, vector<1x1x16xf32>,
    %c2_i32 = arith.constant 2 : i32
    %c4_i32_28 = arith.constant 4 : i32
    %79 = arith.muli %arg0, %c4_i32_28 : i32
    %80 = arith.addi %79, %c2_i32 : i32
    %81 = arith.index_cast %80 : i32 to index
    %82 = memref.load %arg3[%81] : memref<8xf32, #tpu.memory_space<smem>>
    %cst_29 = arith.constant 0.000000e+00 : f32
    %83 = arith.subf %cst_29, %82 : f32
    %84 = vector.broadcast %83 : f32 to vector<16x16xf32>
    %85 = arith.mulf %13, %84 : vector<16x16xf32>
    %86 = math.exp %85 : vector<16x16xf32>
    %87 = arith.truncf %86 : vector<16x16xf32> to vector<16x16xbf16>
    %cst_30 = arith.constant dense<0.000000e+00> : vector<2x16xf32>
    %88 = tpu.matmul %24, %87, %cst_30 {dimension_numbers = #tpu.dot_dimension_numbers<[1], [0], [0], [1], [0, 0, 1, 1], [], []>} : vector<2x16xbf16>, vector<16x16xbf16>, vector<2x16xf32> -> vector<2x16xf32>
    %89 = arith.index_cast %c2_i32 : i32 to index
    %c0_31 = arith.constant 0 : index
    %c0_32 = arith.constant 0 : index
    %90 = vector.load %arg7[%89, %c0_31, %c0_32] : memref<4x2x16xf32, #tpu.memory_space<vmem>>, vector<1x2x16xf32>
    %91 = vector.shape_cast %90 : vector<1x2x16xf32> to vector<2x16xf32>
    %92 = arith.addf %91, %88 : vector<2x16xf32>
    %93 = arith.index_cast %c2_i32 : i32 to index
    %c0_33 = arith.constant 0 : index
    %c0_34 = arith.constant 0 : index
    %94 = vector.load %arg7[%93, %c0_33, %c0_34] : memref<4x2x16xf32, #tpu.memory_space<vmem>>, vector<1x2x16xf32>
    %95 = vector.shape_cast %94 : vector<1x2x16xf32> to vector<2x16xf32>
    %96 = vector.shape_cast %92 : vector<2x16xf32> to vector<1x2x16xf32>
    tpu.vector_store %arg7[%93, %c0_33, %c0_34], %96 {strides = array<i32>} : memref<4x2x16xf32, #tpu.memory_space<vmem>>, vector<1x2x16xf32>,
    %cst_35 = arith.constant dense<0.000000e+00> : vector<1x16xf32>
    %97 = tpu.matmul %21, %87, %cst_35 {dimension_numbers = #tpu.dot_dimension_numbers<[1], [0], [0], [1], [0, 0, 1, 1], [], []>} : vector<1x16xbf16>, vector<16x16xbf16>, vector<1x16xf32> -> vector<1x16xf32>
    %98 = arith.index_cast %c2_i32 : i32 to index
    %c0_36 = arith.constant 0 : index
    %c0_37 = arith.constant 0 : index
    %99 = vector.load %arg8[%98, %c0_36, %c0_37] : memref<4x1x16xf32, #tpu.memory_space<vmem>>, vector<1x1x16xf32>
    %100 = vector.shape_cast %99 : vector<1x1x16xf32> to vector<1x16xf32>
    %101 = arith.addf %100, %97 : vector<1x16xf32>
    %102 = arith.index_cast %c2_i32 : i32 to index
    %c0_38 = arith.constant 0 : index
    %c0_39 = arith.constant 0 : index
    %103 = vector.load %arg8[%102, %c0_38, %c0_39] : memref<4x1x16xf32, #tpu.memory_space<vmem>>, vector<1x1x16xf32>
    %104 = vector.shape_cast %103 : vector<1x1x16xf32> to vector<1x16xf32>
    %105 = vector.shape_cast %101 : vector<1x16xf32> to vector<1x1x16xf32>
    tpu.vector_store %arg8[%102, %c0_38, %c0_39], %105 {strides = array<i32>} : memref<4x1x16xf32, #tpu.memory_space<vmem>>, vector<1x1x16xf32>,
    %c3_i32 = arith.constant 3 : i32
    %c4_i32_40 = arith.constant 4 : i32
    %106 = arith.muli %arg0, %c4_i32_40 : i32
    %107 = arith.addi %106, %c3_i32 : i32
    %108 = arith.index_cast %107 : i32 to index
    %109 = memref.load %arg3[%108] : memref<8xf32, #tpu.memory_space<smem>>
    %cst_41 = arith.constant 0.000000e+00 : f32
    %110 = arith.subf %cst_41, %109 : f32
    %111 = vector.broadcast %110 : f32 to vector<16x16xf32>
    %112 = arith.mulf %13, %111 : vector<16x16xf32>
    %113 = math.exp %112 : vector<16x16xf32>
    %114 = arith.truncf %113 : vector<16x16xf32> to vector<16x16xbf16>
    %cst_42 = arith.constant dense<0.000000e+00> : vector<2x16xf32>
    %115 = tpu.matmul %24, %114, %cst_42 {dimension_numbers = #tpu.dot_dimension_numbers<[1], [0], [0], [1], [0, 0, 1, 1], [], []>} : vector<2x16xbf16>, vector<16x16xbf16>, vector<2x16xf32> -> vector<2x16xf32>
    %116 = arith.index_cast %c3_i32 : i32 to index
    %c0_43 = arith.constant 0 : index
    %c0_44 = arith.constant 0 : index
    %117 = vector.load %arg7[%116, %c0_43, %c0_44] : memref<4x2x16xf32, #tpu.memory_space<vmem>>, vector<1x2x16xf32>
    %118 = vector.shape_cast %117 : vector<1x2x16xf32> to vector<2x16xf32>
    %119 = arith.addf %118, %115 : vector<2x16xf32>
    %120 = arith.index_cast %c3_i32 : i32 to index
    %c0_45 = arith.constant 0 : index
    %c0_46 = arith.constant 0 : index
    %121 = vector.load %arg7[%120, %c0_45, %c0_46] : memref<4x2x16xf32, #tpu.memory_space<vmem>>, vector<1x2x16xf32>
    %122 = vector.shape_cast %121 : vector<1x2x16xf32> to vector<2x16xf32>
    %123 = vector.shape_cast %119 : vector<2x16xf32> to vector<1x2x16xf32>
    tpu.vector_store %arg7[%120, %c0_45, %c0_46], %123 {strides = array<i32>} : memref<4x2x16xf32, #tpu.memory_space<vmem>>, vector<1x2x16xf32>,
    %cst_47 = arith.constant dense<0.000000e+00> : vector<1x16xf32>
    %124 = tpu.matmul %21, %114, %cst_47 {dimension_numbers = #tpu.dot_dimension_numbers<[1], [0], [0], [1], [0, 0, 1, 1], [], []>} : vector<1x16xbf16>, vector<16x16xbf16>, vector<1x16xf32> -> vector<1x16xf32>
    %125 = arith.index_cast %c3_i32 : i32 to index
    %c0_48 = arith.constant 0 : index
    %c0_49 = arith.constant 0 : index
    %126 = vector.load %arg8[%125, %c0_48, %c0_49] : memref<4x1x16xf32, #tpu.memory_space<vmem>>, vector<1x1x16xf32>
    %127 = vector.shape_cast %126 : vector<1x1x16xf32> to vector<1x16xf32>
    %128 = arith.addf %127, %124 : vector<1x16xf32>
    %129 = arith.index_cast %c3_i32 : i32 to index
    %c0_50 = arith.constant 0 : index
    %c0_51 = arith.constant 0 : index
    %130 = vector.load %arg8[%129, %c0_50, %c0_51] : memref<4x1x16xf32, #tpu.memory_space<vmem>>, vector<1x1x16xf32>
    %131 = vector.shape_cast %130 : vector<1x1x16xf32> to vector<1x16xf32>
    %132 = vector.shape_cast %128 : vector<1x16xf32> to vector<1x1x16xf32>
    tpu.vector_store %arg8[%129, %c0_50, %c0_51], %132 {strides = array<i32>} : memref<4x1x16xf32, #tpu.memory_space<vmem>>, vector<1x1x16xf32>,
    %c4_i32_52 = arith.constant 4 : i32
    %c0_i32_53 = arith.constant 0 : i32
    %133 = arith.cmpi eq, %arg2, %c0_i32_53 : i32
    %134 = arith.extui %133 : i1 to i32
    %c0_i32_54 = arith.constant 0 : i32
    %135 = arith.cmpi ne, %134, %c0_i32_54 : i32
    scf.if %135 {
      %cst_55 = arith.constant 0.000000e+00 : f32
      %136 = vector.broadcast %cst_55 : f32 to vector<2x16xf32>
      %c4_i32_56 = arith.constant 4 : i32
      %137 = arith.muli %arg0, %c4_i32_56 : i32
      %c0_i32_57 = arith.constant 0 : i32
      %138 = arith.addi %137, %c0_i32_57 : i32
      %139 = arith.index_cast %138 : i32 to index
      %140 = memref.load %arg4[%139] : memref<8xf32, #tpu.memory_space<smem>>
      %c0_58 = arith.constant 0 : index
      %c0_59 = arith.constant 0 : index
      %c0_60 = arith.constant 0 : index
      %141 = vector.load %arg7[%c0_58, %c0_59, %c0_60] : memref<4x2x16xf32, #tpu.memory_space<vmem>>, vector<1x2x16xf32>
      %142 = vector.shape_cast %141 : vector<1x2x16xf32> to vector<2x16xf32>
      %c0_61 = arith.constant 0 : index
      %c0_62 = arith.constant 0 : index
      %c0_63 = arith.constant 0 : index
      %143 = vector.load %arg8[%c0_61, %c0_62, %c0_63] : memref<4x1x16xf32, #tpu.memory_space<vmem>>, vector<1x1x16xf32>
      %144 = vector.shape_cast %143 : vector<1x1x16xf32> to vector<1x16xf32>
      %cst_64 = arith.constant 1.000000e-30 : f32
      %145 = vector.broadcast %cst_64 : f32 to vector<1x16xf32>
      %146 = arith.maximumf %144, %145 : vector<1x16xf32>
      %147 = vector.broadcast %146 : vector<1x16xf32> to vector<2x16xf32>
      %148 = arith.divf %142, %147 : vector<2x16xf32>
      %149 = vector.broadcast %140 : f32 to vector<2x16xf32>
      %150 = arith.mulf %149, %148 : vector<2x16xf32>
      %151 = arith.addf %136, %150 : vector<2x16xf32>
      %c4_i32_65 = arith.constant 4 : i32
      %152 = arith.muli %arg0, %c4_i32_65 : i32
      %c1_i32_66 = arith.constant 1 : i32
      %153 = arith.addi %152, %c1_i32_66 : i32
      %154 = arith.index_cast %153 : i32 to index
      %155 = memref.load %arg4[%154] : memref<8xf32, #tpu.memory_space<smem>>
      %c1 = arith.constant 1 : index
      %c0_67 = arith.constant 0 : index
      %c0_68 = arith.constant 0 : index
      %156 = vector.load %arg7[%c1, %c0_67, %c0_68] : memref<4x2x16xf32, #tpu.memory_space<vmem>>, vector<1x2x16xf32>
      %157 = vector.shape_cast %156 : vector<1x2x16xf32> to vector<2x16xf32>
      %c1_69 = arith.constant 1 : index
      %c0_70 = arith.constant 0 : index
      %c0_71 = arith.constant 0 : index
      %158 = vector.load %arg8[%c1_69, %c0_70, %c0_71] : memref<4x1x16xf32, #tpu.memory_space<vmem>>, vector<1x1x16xf32>
      %159 = vector.shape_cast %158 : vector<1x1x16xf32> to vector<1x16xf32>
      %cst_72 = arith.constant 1.000000e-30 : f32
      %160 = vector.broadcast %cst_72 : f32 to vector<1x16xf32>
      %161 = arith.maximumf %159, %160 : vector<1x16xf32>
      %162 = vector.broadcast %161 : vector<1x16xf32> to vector<2x16xf32>
      %163 = arith.divf %157, %162 : vector<2x16xf32>
      %164 = vector.broadcast %155 : f32 to vector<2x16xf32>
      %165 = arith.mulf %164, %163 : vector<2x16xf32>
      %166 = arith.addf %151, %165 : vector<2x16xf32>
      %c4_i32_73 = arith.constant 4 : i32
      %167 = arith.muli %arg0, %c4_i32_73 : i32
      %c2_i32_74 = arith.constant 2 : i32
      %168 = arith.addi %167, %c2_i32_74 : i32
      %169 = arith.index_cast %168 : i32 to index
      %170 = memref.load %arg4[%169] : memref<8xf32, #tpu.memory_space<smem>>
      %c2 = arith.constant 2 : index
      %c0_75 = arith.constant 0 : index
      %c0_76 = arith.constant 0 : index
      %171 = vector.load %arg7[%c2, %c0_75, %c0_76] : memref<4x2x16xf32, #tpu.memory_space<vmem>>, vector<1x2x16xf32>
      %172 = vector.shape_cast %171 : vector<1x2x16xf32> to vector<2x16xf32>
      %c2_77 = arith.constant 2 : index
      %c0_78 = arith.constant 0 : index
      %c0_79 = arith.constant 0 : index
      %173 = vector.load %arg8[%c2_77, %c0_78, %c0_79] : memref<4x1x16xf32, #tpu.memory_space<vmem>>, vector<1x1x16xf32>
      %174 = vector.shape_cast %173 : vector<1x1x16xf32> to vector<1x16xf32>
      %cst_80 = arith.constant 1.000000e-30 : f32
      %175 = vector.broadcast %cst_80 : f32 to vector<1x16xf32>
      %176 = arith.maximumf %174, %175 : vector<1x16xf32>
      %177 = vector.broadcast %176 : vector<1x16xf32> to vector<2x16xf32>
      %178 = arith.divf %172, %177 : vector<2x16xf32>
      %179 = vector.broadcast %170 : f32 to vector<2x16xf32>
      %180 = arith.mulf %179, %178 : vector<2x16xf32>
      %181 = arith.addf %166, %180 : vector<2x16xf32>
      %c4_i32_81 = arith.constant 4 : i32
      %182 = arith.muli %arg0, %c4_i32_81 : i32
      %c3_i32_82 = arith.constant 3 : i32
      %183 = arith.addi %182, %c3_i32_82 : i32
      %184 = arith.index_cast %183 : i32 to index
      %185 = memref.load %arg4[%184] : memref<8xf32, #tpu.memory_space<smem>>
      %c3 = arith.constant 3 : index
      %c0_83 = arith.constant 0 : index
      %c0_84 = arith.constant 0 : index
      %186 = vector.load %arg7[%c3, %c0_83, %c0_84] : memref<4x2x16xf32, #tpu.memory_space<vmem>>, vector<1x2x16xf32>
      %187 = vector.shape_cast %186 : vector<1x2x16xf32> to vector<2x16xf32>
      %c3_85 = arith.constant 3 : index
      %c0_86 = arith.constant 0 : index
      %c0_87 = arith.constant 0 : index
      %188 = vector.load %arg8[%c3_85, %c0_86, %c0_87] : memref<4x1x16xf32, #tpu.memory_space<vmem>>, vector<1x1x16xf32>
      %189 = vector.shape_cast %188 : vector<1x1x16xf32> to vector<1x16xf32>
      %cst_88 = arith.constant 1.000000e-30 : f32
      %190 = vector.broadcast %cst_88 : f32 to vector<1x16xf32>
      %191 = arith.maximumf %189, %190 : vector<1x16xf32>
      %192 = vector.broadcast %191 : vector<1x16xf32> to vector<2x16xf32>
      %193 = arith.divf %187, %192 : vector<2x16xf32>
      %194 = vector.broadcast %185 : f32 to vector<2x16xf32>
      %195 = arith.mulf %194, %193 : vector<2x16xf32>
      %196 = arith.addf %181, %195 : vector<2x16xf32>
      %c0_89 = arith.constant 0 : index
      %c0_90 = arith.constant 0 : index
      %c0_91 = arith.constant 0 : index
      %197 = vector.load %arg6[%c0_89, %c0_90, %c0_91] : memref<1x2x16xf32, #tpu.memory_space<vmem>>, vector<1x2x16xf32>
      %198 = vector.shape_cast %197 : vector<1x2x16xf32> to vector<2x16xf32>
      %199 = vector.shape_cast %196 : vector<2x16xf32> to vector<1x2x16xf32>
      tpu.vector_store %arg6[%c0_89, %c0_90, %c0_91], %199 {strides = array<i32>} : memref<1x2x16xf32, #tpu.memory_space<vmem>>, vector<1x2x16xf32>,
    } else {
    }
    return
  }
  func.func @transform_0(%arg0: i32, %arg1: i32, %arg2: i32) -> i32 {
    %c0_i32 = arith.constant 0 : i32
    %c0_i32_0 = arith.constant 0 : i32
    return %c0_i32 : i32
  }
  func.func @transform_1(%arg0: i32, %arg1: i32, %arg2: i32) -> i32 {
    %c0_i32 = arith.constant 0 : i32
    %c0_i32_0 = arith.constant 0 : i32
    return %c0_i32 : i32
  }
  func.func @transform_2(%arg0: i32, %arg1: i32, %arg2: i32) -> (i32, i32, i32) {
    %c0_i32 = arith.constant 0 : i32
    %c0_i32_0 = arith.constant 0 : i32
    return %arg0, %c0_i32, %arg2 : i32, i32, i32
  }
  func.func @transform_3(%arg0: i32, %arg1: i32, %arg2: i32) -> (i32, i32, i32) {
    %c0_i32 = arith.constant 0 : i32
    %c0_i32_0 = arith.constant 0 : i32
    return %arg0, %c0_i32, %arg1 : i32, i32, i32
  }
}

</mosaic_0001>

<bundles_post_ra>
// kernel: cagke_multi_forward.1
= control target key start
LH: loop header
LB: loop body
LE: loop exit
PB: predicated region body
PF: predicated region fallthrough
CT: control target
= control target key end

     0   :  { %8 = vsyncpa [#allocation5], 0  ;;  %s1257_s0 = inlined_call_operand.vmem [shape: f32[8], index: 0, kind: input, shape index: {}]   ;;  %s1258_s1 = inlined_call_operand.vmem [shape: f32[8], index: 1, kind: input, shape index: {}]   ;;  %s1259_s2 = inlined_call_operand.vmem [shape: f32[2,2,16], index: 2, kind: input, shape index: {}]   ;;  %s1260_s3 = inlined_call_operand.vmem [shape: f32[2,2,16], index: 3, kind: output, shape index: {}]  }
   0x1   :  { %9 = vsyncpa [#allocation7], 0  ;;  %s1082_s12 = smov 0   ;;  %s1084_s13 = smov 0  }
   0x2   :  { %s1086_s14 = smov 0  }
   0x3 LB: > { %s838_s15 = sadd.s32 4294967295, %s1056_s14   ;;  %s34_s16 = sadd.s32 1, %s1052_s13  ;;  %s1056_s14 = sphi %s1086_s14, %s15_s14   ;;  %s1052_s13 = sphi %s1084_s13, %s1270_s13   ;;  %s1048_s12 = sphi %s1082_s12, %s1269_s12  }
   0x4   : > { %p36_p0 = scmp.ge.s32.totalorder %s34_s16, 2  ;;  %p840_p1 = scmp.ge.s32.totalorder %s1056_s14, 1 }
   0x5   : > { %p137_p2 = scmp.lt.s32.totalorder %s1056_s14, 3  ;;  %p1107_p4 = scmp.eq.s32.totalorder %s838_s15, 0 }
   0x6   : > { %s1272_s16 = smov (%p36_p0, %s34_s16), 0  ;;  %s150_s21 = sshll.u32 %s1257_s0, 4  ;;  %s151_s21 = int_to_ptr.vmem [resolvable:$true] %s150_s21 }
   0x7   : > { %p1103_p3 = pnand %p840_p1, %p137_p2  ;;  %s161_s24 = sshll.u32 %s1258_s1, 4  ;;  %s162_s24 = int_to_ptr.vmem [resolvable:$true] %s161_s24 }
   0x8   : > { %s1265_s18 = scalar_select %p1107_p4, 1, 0 }
   0x9   : > { %s1264_s17 = scalar_select %p1103_p3, 1, 0 }
   0xa   : > { %p933_p5 = pneg %p1103_p3  ;;  %s996_s26 = scalar_lea.vmem %s151_s21, 16 }
   0xb   : > { %p997_p7 = scmp.ne.s32.totalorder %s151_s21, %s996_s26  ;;  %p1004_p11 = scmp.lt.s32.totalorder %s151_s21, %s151_s21 }
   0xc   : > { %p1121_p6 = pnand %p1107_p4, %p933_p5  ;;  %p1005_p12 = scmp.lt.s32.totalorder %s996_s26, %s996_s26 }
   0xe   : > { %p998_p8 = pneg %p1121_p6  ;;  %p1006_p13 = por %p1005_p12, %p1004_p11 }
  0x10   : > { %p999_p9 = pnand %p998_p8, %p997_p7 }
  0x12   : > { %p1000_p10 = pneg %p999_p9 }
  0x14   : > { %p1007_p0 = pnand %p1006_p13, %p1000_p10 }
  0x16   : > { %1010 = shalt.err (!%p1007_p0)
}
  0x17   : > { %s1058_s27 = smov [#allocation4]   ;;  %s1011_s28 = scalar_lea.vmem %s162_s24, 16 }
  0x18   : > { %936 = dma.vmem_to_smem (!%p1121_p6), %s151_s21, 16, %s1058_s27, [#allocation5]  }
  0x19   : > { %p1012_p1 = scmp.ne.s32.totalorder %s162_s24, %s1011_s28  ;;  %p1019_p4 = scmp.lt.s32.totalorder %s162_s24, %s162_s24 }
  0x1a   : > { %p1020_p3 = scmp.lt.s32.totalorder %s1011_s28, %s1011_s28 }
  0x1b   : > { %p1014_p2 = pnand %p1012_p1, %p998_p8 }
  0x1c   : > { %p1021_p7 = por %p1020_p3, %p1019_p4 }
  0x1d   : > { %p1015_p5 = pneg %p1014_p2 }
  0x1f   : > { %p1022_p9 = pnand %p1021_p7, %p1015_p5 }
  0x21   : > { %1025 = shalt.err (!%p1022_p9)
}
  0x22   : > { %s1059_s29 = smov [#allocation6]   ;;  %p1267_p10 = scmp.ne.s32.totalorder %s1264_s17, 0 }
  0x23   : > { %939 = dma.vmem_to_smem (!%p1121_p6), %s162_s24, 16, %s1059_s29, [#allocation7]  }
  0x24   : > { %184 = sbr.rel (%p1267_p10) target bundleno = 348 (0x15c), region = 32  ;;  %p1268_p11 = scmp.ne.s32.totalorder (!%p1267_p10), %s1265_s18, 0 }
  0x2b   : > { %1039 = dma.done.wait (%p1268_p11), [#allocation5], 16  }
  0x2c   : > { %1041 = vsyncadd (%p1268_p11), [#allocation5], 4294967280 }
  0x2d   : > { %1043 = dma.done.wait (%p1268_p11), [#allocation7], 16  }
  0x2e   : > { %1045 = vsyncadd (%p1268_p11), [#allocation7], 4294967280 }
  0x2f   : > { %194 = sfence }
  0x30   : > { %v248_v0 = vlaneseq  ;;  %s1142_s30 = sshll.u32 %s1048_s12, 2  ;;  %v1060_v1 = vmov 0.0   ;;  %vm1061_vm0 = vmmov 0   ;;  %vm243_vm1 = vcmask 122880   ;;  %p217_p3 = scmp.lt.s32.totalorder %s1048_s12, 1 }
  0x31   : > { %883 = vmatprep.subr.bf16.mxu1 %v1060_v1  ;;  %s272_s4 = sld [smem:[#allocation4 + %s1142_s30]]  ;;  %885 = vmatprep.mubr.msk.bf16.mxu1 %vm1061_vm0, %v1060_v1  ;;  %s377_s5 = sadd.s32 1, %s1142_s30  ;;  %244 = vst.msk [vmem:[#allocation3] sm:$0x1] %vm243_vm1, %v1060_v1  ;;  %245 = vst.msk [vmem:[#allocation3 + $0x1] sm:$0x1] %vm243_vm1, %v1060_v1 }
  0x32   : > { %v1148_v2 = vshrl.u32 %v248_v0, 7  ;;  %v255_v3 = vand.u32 127, %v248_v0  ;;  %877 = vmatprep.subr.bf16.mxu0 %v1060_v1  ;;  %s476_s6 = sadd.s32 2, %s1142_s30  ;;  %879 = vmatprep.mubr.msk.bf16.mxu0 %vm1061_vm0, %v1060_v1  ;;  %246 = vst.msk [vmem:[#allocation3 + $0x2] sm:$0x1] %vm243_vm1, %v1060_v1  ;;  %s378_s7 = sld [smem:[#allocation4 + %s377_s5]] }
  0x33   : > { %247 = vst.msk [vmem:[#allocation3 + $0x3] sm:$0x1] %vm243_vm1, %v1060_v1  ;;  %s477_s8 = sld [smem:[#allocation4 + %s476_s6]]  ;;  %s575_s9 = sadd.s32 3, %s1142_s30  ;;  %vm282_vm3 = vcmask 130048   ;;  %vm238_vm4 = vcmask 123904  }
  0x34   : > { %v250_v4 = vadd.s32 8, %v1148_v2  ;;  %v258_v5 = vsub.s32 %v1148_v2, %v255_v3  ;;  %s576_s15 = sld [smem:[#allocation4 + %s575_s9]]  ;;  %s1274_s12 = smov (!%p217_p3, %s1048_s12), 1  ;;  %vm265_vm2 = vcmp.lt.s32.totalorder %v255_v3, 16  ;;  %239 = vst.msk [vmem:[#allocation2] sm:$0x3] %vm238_vm4, %v1060_v1 }
  0x35   : > { %s847_s19 = sshll.u32 %s1274_s12, 1  ;;  %v849_v30 = vsel %vm265_vm2, 1.0, %v1060_v1  ;;  %240 = vst.msk [vmem:[#allocation2 + $0x2] sm:$0x3] %vm238_vm4, %v1060_v1  ;;  %241 = vst.msk [vmem:[#allocation2 + $0x4] sm:$0x3] %vm238_vm4, %v1060_v1 }
  0x36   : > { %v259_v6 = vsub.s32 %v250_v4, %v255_v3  ;;  %v260_v7 = vcvt.s32.f32 %v258_v5  ;;  %s223_s22 = scalar_lea.vmem %s1259_s2, %s847_s19  ;;  %v268_v37 = vpack.c.bf16 %v849_v30, %v849_v30  ;;  %242 = vst.msk [vmem:[#allocation2 + $0x6] sm:$0x3] %vm238_vm4, %v1060_v1  ;;  %v1220_v63 = vsub.s32 0, %v1148_v2  ;;  %s1226_s23 = sld [smem:[#allocation6 + %s1142_s30]] }
  0x37   : > { %s273_s10 = ssub.f32 0.0, %s272_s4  ;;  %v269_v31 = vld [vmem:[%s223_s22] sm:$0x3]  ;;  %s692_s24 = sld [smem:[#allocation6 + %s377_s5]] }
  0x38   : > { %v261_v8 = vcvt.s32.f32 %v259_v6  ;;  %v262_v9 = vmul.f32 %v260_v7, %v260_v7  ;;  %s379_s11 = ssub.f32 0.0, %s378_s7  ;;  %v270_v38 = vpack.c.bf16 %v269_v31, %v269_v31  ;;  %v373_v47 = vld [vmem:[#allocation3] sm:$0x1]  ;;  %v473_v59 = vld [vmem:[#allocation3 + $0x1] sm:$0x1]  ;;  %s707_s25 = sld [smem:[#allocation6 + %s476_s6]] }
  0x39   : > { %v274_v10 = vstv %s273_s10  ;;  %s478_s17 = ssub.f32 0.0, %s477_s8  ;;  %s722_s26 = sld [smem:[#allocation6 + %s575_s9]] }
  0x3a   : > { %v263_v11 = vmul.f32 %v261_v8, %v261_v8  ;;  %v275_v12 = vmul.f32 %v274_v10, %v262_v9  ;;  %v380_v13 = vstv %s379_s11  ;;  %s577_s18 = ssub.f32 0.0, %s576_s15  ;;  %s230_s29 = scalar_lea.vmem %s1260_s3, %s847_s19 }
  0x3b   : > { %v381_v16 = vmul.f32 %v380_v13, %v262_v9  ;;  %v479_v18 = vstv %s478_s17  ;;  %v326_v48 = vld [vmem:[#allocation2] sm:$0x3] }
  0x3c   : > { %v276_v14 = vmul.f32 %v274_v10, %v263_v11  ;;  %v277_v15 = vmul.f32 1.442695, %v275_v12  ;;  %v382_v17 = vmul.f32 %v380_v13, %v263_v11  ;;  %v480_v22 = vmul.f32 %v479_v18, %v262_v9  ;;  %v429_v60 = vld [vmem:[#allocation2 + $0x2] sm:$0x3]  ;;  %v572_v12 = vld [vmem:[#allocation3 + $0x2] sm:$0x1] }
  0x3d   : > { %v383_v20 = vmul.f32 1.442695, %v381_v16  ;;  %v481_v23 = vmul.f32 %v479_v18, %v263_v11  ;;  %v578_v26 = vstv %s577_s18  ;;  %v528_v2 = vld [vmem:[#allocation2 + $0x4] sm:$0x3] }
  0x3e   : > { %972 = vpow2.f32 %v277_v15  ;;  %v279_v19 = vmul.f32 1.442695, %v276_v14  ;;  %v385_v21 = vmul.f32 1.442695, %v382_v17  ;;  %v482_v24 = vmul.f32 1.442695, %v480_v22 }
  0x3f   : > { %v484_v25 = vmul.f32 1.442695, %v481_v23  ;;  %v579_v27 = vmul.f32 %v578_v26, %v262_v9  ;;  %v580_v29 = vmul.f32 %v578_v26, %v263_v11  ;;  %v671_v26 = vld [vmem:[#allocation3 + $0x3] sm:$0x1] }
  0x40   : > { %974 = vpow2.f32 %v279_v19 }
  0x41   : > { %976 = vpow2.f32 %v383_v20  ;;  %v581_v35 = vmul.f32 1.442695, %v579_v27  ;;  %v583_v39 = vmul.f32 1.442695, %v580_v29  ;;  %v627_v27 = vld [vmem:[#allocation2 + $0x6] sm:$0x3] }
  0x42   : > { %978 = vpow2.f32 %v385_v21 }
  0x43   : > { %980 = vpow2.f32 %v482_v24 }
  0x44   : > { %982 = vpow2.f32 %v484_v25 }
  0x45   : > { %984 = vpow2.f32 %v581_v35 }
  0x46   : > { %986 = vpow2.f32 %v583_v39 }
  0x48   : > { %v973_v28 = vpop.eup %972 }
  0x4a   : > { %v975_v32 = vpop.eup %974 }
  0x4b   : > { %v977_v33 = vpop.eup %976  ;;  %v281_v34 = vpack.c.bf16 %v975_v32, %v973_v28  ;;  %v689_v32 = vstv %s1226_s23 }
  0x4c   : > { %v979_v36 = vpop.eup %978 }
  0x4d   : > { %884 = vmatpush3.bf16.msra.mxu1 %v281_v34  ;;  %v387_v40 = vpack.c.bf16 %v979_v36, %v977_v33  ;;  %878 = vmatpush3.bf16.msra.mxu0 %v281_v34  ;;  %v981_v41 = vpop.eup %980 }
  0x4e   : > { %895 = vmatprep.subr.bf16.mxu1 %v1060_v1  ;;  %889 = vmatprep.subr.bf16.mxu0 %v1060_v1  ;;  %v983_v42 = vpop.eup %982 }
  0x4f   : > { %v486_v43 = vpack.c.bf16 %v983_v42, %v981_v41  ;;  %v985_v44 = vpop.eup %984 }
  0x50   : > { %886 = vmatmul.mubr.msk.bf16.vlgmr.msra.gmra.mrb[0].mxu1 %vm282_vm3, %v268_v37  ;;  %880 = vmatmul.mubr.msk.bf16.vlgmr.msra.gmra.mrb[0].mxu0 %vm282_vm3, %v270_v38  ;;  %v987_v45 = vpop.eup %986 }
  0x51   : > { %896 = vmatpush3.bf16.msra.mxu1 %v387_v40  ;;  %897 = vmatprep.mubr.msk.bf16.mxu1 %vm1061_vm0, %v1060_v1  ;;  %v585_v46 = vpack.c.bf16 %v987_v45, %v985_v44 }
  0x52   : > { %907 = vmatprep.subr.bf16.mxu1 %v1060_v1  ;;  %890 = vmatpush3.bf16.msra.mxu0 %v387_v40 }
  0x53   : > { %891 = vmatprep.mubr.msk.bf16.mxu0 %vm1061_vm0, %v1060_v1  ;;  %901 = vmatprep.subr.bf16.mxu0 %v1060_v1 }
  0x58   : > { %898 = vmatmul.mubr.msk.bf16.vlgmr.msra.gmra.mrb[4].mxu1 %vm282_vm3, %v268_v37  ;;  %892 = vmatmul.mubr.msk.bf16.vlgmr.msra.gmra.mrb[4].mxu0 %vm282_vm3, %v270_v38 }
  0x59   : > { %908 = vmatpush3.bf16.msra.mxu1 %v486_v43  ;;  %909 = vmatprep.mubr.msk.bf16.mxu1 %vm1061_vm0, %v1060_v1 }
  0x5a   : > { %919 = vmatprep.subr.bf16.mxu1 %v1060_v1  ;;  %902 = vmatpush3.bf16.msra.mxu0 %v486_v43 }
  0x5b   : > { %903 = vmatprep.mubr.msk.bf16.mxu0 %vm1061_vm0, %v1060_v1  ;;  %913 = vmatprep.subr.bf16.mxu0 %v1060_v1 }
  0x60   : > { %910 = vmatmul.mubr.msk.bf16.vlgmr.msra.gmra.mrb[8].mxu1 %vm282_vm3, %v268_v37  ;;  %904 = vmatmul.mubr.msk.bf16.vlgmr.msra.gmra.mrb[8].mxu0 %vm282_vm3, %v270_v38 }
  0x61   : > { %920 = vmatpush3.bf16.msra.mxu1 %v585_v46  ;;  %921 = vmatprep.mubr.msk.bf16.mxu1 %vm1061_vm0, %v1060_v1 }
  0x62   : > { %914 = vmatpush3.bf16.msra.mxu0 %v585_v46  ;;  %915 = vmatprep.mubr.msk.bf16.mxu0 %vm1061_vm0, %v1060_v1 }
  0x68   : > { %922 = vmatmul.mubr.msk.bf16.vlgmr.msra.gmra.mrb[12].mxu1 %vm282_vm3, %v268_v37  ;;  %916 = vmatmul.mubr.msk.bf16.vlgmr.msra.gmra.mrb[12].mxu0 %vm282_vm3, %v270_v38 }
 0x123   : > { %v367_v49 = vpop.f32.mrb[0].mxu1  ;;  %v320_v50 = vpop.f32.mrb[0].mxu0 }
 0x124   : > { %v374_v51 = vadd.f32 %v373_v47, %v367_v49  ;;  %v887_v52 = vpop.f32.mrb[1].mxu1  ;;  %v327_v53 = vadd.f32 %v326_v48, %v320_v50  ;;  %v881_v54 = vpop.f32.mrb[1].mxu0  ;;  %v704_v48 = vstv %s692_s24 }
 0x125   : > { %v370_v55 = vpop.f32.mrb[2].mxu1  ;;  %v323_v56 = vpop.f32.mrb[2].mxu0 }
 0x126   : > { %376 = vst.msk [vmem:[#allocation3] sm:$0x1] %vm243_vm1, %v374_v51  ;;  %v888_v57 = vpop.f32.mrb[3].mxu1  ;;  %v882_v58 = vpop.f32.mrb[3].mxu0 }
 0x127   : > { %329 = vst.msk [vmem:[#allocation2] sm:$0x3] %vm238_vm4, %v327_v53  ;;  %v719_v57 = vstv %s707_s25 }
 0x12b   : > { %v466_v61 = vpop.f32.mrb[4].mxu1  ;;  %v422_v62 = vpop.f32.mrb[4].mxu0 }
 0x12c   : > { %v474_v0 = vadd.f32 %v473_v59, %v466_v61  ;;  %v899_v1 = vpop.f32.mrb[5].mxu1  ;;  %v430_v3 = vadd.f32 %v429_v60, %v422_v62  ;;  %v893_v4 = vpop.f32.mrb[5].mxu0 }
 0x12d   : > { %v679_v5 = vld [vmem:[#allocation3] sm:$0x1]  ;;  %v469_v6 = vpop.f32.mrb[6].mxu1  ;;  %v425_v7 = vpop.f32.mrb[6].mxu0 }
 0x12e   : > { %v680_v8 = vmax.f32 %v679_v5, 1e-30  ;;  %475 = vst.msk [vmem:[#allocation3 + $0x1] sm:$0x1] %vm243_vm1, %v474_v0  ;;  %v900_v9 = vpop.f32.mrb[7].mxu1  ;;  %v894_v10 = vpop.f32.mrb[7].mxu0  ;;  %v734_v0 = vstv %s722_s26 }
 0x12f   : > { %431 = vst.msk [vmem:[#allocation2 + $0x2] sm:$0x3] %vm238_vm4, %v430_v3  ;;  %v678_v28 = vld [vmem:[#allocation2] sm:$0x3] }
 0x130   : > { %v685_v11 = vrot.slane %v680_v8, %v1220_v63 }
 0x132   : > { %988 = vrcp.f32 %v685_v11 }
 0x133   : > { %v565_v13 = vpop.f32.mrb[8].mxu1  ;;  %v521_v14 = vpop.f32.mrb[8].mxu0 }
 0x134   : > { %v573_v15 = vadd.f32 %v572_v12, %v565_v13  ;;  %v911_v16 = vpop.f32.mrb[9].mxu1  ;;  %v529_v17 = vadd.f32 %v528_v2, %v521_v14  ;;  %v905_v18 = vpop.f32.mrb[9].mxu0 }
 0x135   : > { %v694_v19 = vld [vmem:[#allocation3 + $0x1] sm:$0x1]  ;;  %v568_v20 = vpop.f32.mrb[10].mxu1  ;;  %v524_v21 = vpop.f32.mrb[10].mxu0 }
 0x136   : > { %v695_v22 = vmax.f32 %v694_v19, 1e-30  ;;  %574 = vst.msk [vmem:[#allocation3 + $0x2] sm:$0x1] %vm243_vm1, %v573_v15  ;;  %v912_v23 = vpop.f32.mrb[11].mxu1  ;;  %v906_v24 = vpop.f32.mrb[11].mxu0 }
 0x137   : > { %530 = vst.msk [vmem:[#allocation2 + $0x4] sm:$0x3] %vm238_vm4, %v529_v17  ;;  %v693_v46 = vld [vmem:[#allocation2 + $0x2] sm:$0x3] }
 0x138   : > { %v700_v25 = vrot.slane %v695_v22, %v1220_v63 }
 0x13a   : > { %990 = vrcp.f32 %v700_v25 }
 0x13b   : > { %v664_v29 = vpop.f32.mrb[12].mxu1  ;;  %v620_v30 = vpop.f32.mrb[12].mxu0 }
 0x13c   : > { %v989_v31 = vpop.eup %988  ;;  %v672_v33 = vadd.f32 %v671_v26, %v664_v29  ;;  %v923_v34 = vpop.f32.mrb[13].mxu1  ;;  %v628_v35 = vadd.f32 %v627_v27, %v620_v30 }
 0x13d   : > { %v917_v36 = vpop.f32.mrb[13].mxu0  ;;  %v688_v37 = vmul.f32 %v989_v31, %v678_v28  ;;  %v709_v38 = vld [vmem:[#allocation3 + $0x2] sm:$0x1]  ;;  %v667_v39 = vpop.f32.mrb[14].mxu1 }
 0x13e   : > { %v623_v40 = vpop.f32.mrb[14].mxu0  ;;  %v710_v41 = vmax.f32 %v709_v38, 1e-30  ;;  %673 = vst.msk [vmem:[#allocation3 + $0x3] sm:$0x1] %vm243_vm1, %v672_v33  ;;  %v924_v42 = vpop.f32.mrb[15].mxu1 }
 0x13f   : > { %629 = vst.msk [vmem:[#allocation2 + $0x6] sm:$0x3] %vm238_vm4, %v628_v35  ;;  %v918_v43 = vpop.f32.mrb[15].mxu0  ;;  %v690_v44 = vmul.f32 %v689_v32, %v688_v37  ;;  %v708_v55 = vld [vmem:[#allocation2 + $0x4] sm:$0x3] }
 0x140   : > { %v715_v45 = vrot.slane %v710_v41, %v1220_v63 }
 0x142   : > { %992 = vrcp.f32 %v715_v45 }
 0x144   : > { %v991_v47 = vpop.eup %990 }
 0x145   : > { %v703_v49 = vmul.f32 %v991_v47, %v693_v46  ;;  %v724_v50 = vld [vmem:[#allocation3 + $0x3] sm:$0x1] }
 0x146   : > { %v725_v51 = vmax.f32 %v724_v50, 1e-30  ;;  %v723_v61 = vld [vmem:[#allocation2 + $0x6] sm:$0x3] }
 0x147   : > { %v705_v52 = vmul.f32 %v704_v48, %v703_v49 }
 0x148   : > { %v730_v53 = vrot.slane %v725_v51, %v1220_v63 }
 0x149   : > { %v706_v54 = vadd.f32 %v705_v52, %v690_v44 }
 0x14a   : > { %994 = vrcp.f32 %v730_v53 }
 0x14c   : > { %v993_v56 = vpop.eup %992 }
 0x14d   : > { %v718_v58 = vmul.f32 %v993_v56, %v708_v55 }
 0x14f   : > { %v720_v59 = vmul.f32 %v719_v57, %v718_v58 }
 0x151   : > { %v721_v60 = vadd.f32 %v720_v59, %v706_v54 }
 0x154   : > { %v995_v62 = vpop.eup %994 }
 0x155   : > { %v733_v1 = vmul.f32 %v995_v62, %v723_v61 }
 0x157   : > { %v735_v3 = vmul.f32 %v734_v0, %v733_v1 }
 0x159   : > { %v736_v63 = vadd.f32 %v735_v3, %v721_v60 }
 0x15b   : > { %737 = vst.msk [vmem:[%s230_s29] sm:$0x3] %vm238_vm4, %v736_v63 }
 0x15c PF: > { %s15_s14 = sadd.s32 1, %s1056_s14   ;;  %s1269_s12 = smov %s1052_s13 }
 0x15d   : > { %p12_p4 = scmp.ge.s32.totalorder %s15_s14, 4   ;;  %s1270_s13 = smov %s1272_s16 }
 0x15f   :  { %14 = sbr.rel (!%p12_p4) target bundleno = 3 (0x3), region = 85 }
 0x166   :  { %763 = vsyncpa [#allocation5], 1 }
 0x167   :  { %765 = vsyncpa [#allocation5 + $0x1], 1 }
 0x168   :  { %766 = vsyncpa [#allocation7], 1 }

</bundles_post_ra>
